<compile_context>
chip_gen: v7x
topology: tpu7x:2x2x1
jax: 0.10.0
libtpu: 0.0.40
codegen_flags: <defaults>
</compile_context>

<pallas_src>
import math

import jax
import jax.numpy as jnp
from jax.experimental import pallas as pl
from jax.experimental.pallas import tpu as pltpu


# ---------------------------------------------------------------------------
# Kernel
# ---------------------------------------------------------------------------

def _round_kernel(x_ref, o_ref):
    # jnp.round == round-half-to-even, matching torch.round.
    o_ref[...] = jnp.round(x_ref[...])


# ---------------------------------------------------------------------------
# Wrapper
# ---------------------------------------------------------------------------

_LANE = 512                               # lane-dense last dim (multiple of 128)
_ROW_TILE = 512                           # rows per grid step (multiple of 8)
_SINGLE_BLOCK_BYTES = 4 * 1024 * 1024     # below this, run one ungridded block


def pallas_round(x):
    """Elementwise round-half-to-even (torch.round semantics) via Pallas."""
    shape = x.shape
    dtype = x.dtype
    total = int(math.prod(shape)) if shape else 1

    flat = x.reshape(total)
    itemsize = jnp.dtype(dtype).itemsize

    n_rows = -(-total // _LANE)           # ceil(total / LANE)
    if n_rows * _LANE * itemsize <= _SINGLE_BLOCK_BYTES:
        rows = n_rows                     # single block == full array dims, so
        grid = None                       # the (8,128) divisibility rule is moot
    else:
        rows = -(-n_rows // _ROW_TILE) * _ROW_TILE
        grid = (rows // _ROW_TILE,)

    padded = rows * _LANE
    if padded != total:
        flat = jnp.pad(flat, (0, padded - total))   # round(0) == 0, harmless
    x2 = flat.reshape(rows, _LANE)

    if grid is None:
        out2 = pl.pallas_call(
            _round_kernel,
            out_shape=jax.ShapeDtypeStruct((rows, _LANE), dtype),
        )(x2)
    else:
        out2 = pl.pallas_call(
            _round_kernel,
            out_shape=jax.ShapeDtypeStruct((rows, _LANE), dtype),
            grid=grid,
            in_specs=[pl.BlockSpec((_ROW_TILE, _LANE), lambda i: (i, 0))],
            out_specs=pl.BlockSpec((_ROW_TILE, _LANE), lambda i: (i, 0)),
            compiler_params=pltpu.CompilerParams(
                dimension_semantics=("parallel",)),
        )(x2)

    return out2.reshape(padded)[:total].reshape(shape)


# TODO(synk): the straight-through backward of Quantization (grad passes
# unchanged) is an autograd rule, not a forward op; only the forward is
# implemented here.


# ---------------------------------------------------------------------------

if __name__ == "__main__":
    key = jax.random.PRNGKey(0)

    # Main test: shape consistent with a generic module input.
    x = 3.0 * jax.random.normal(key, (2, 4, 16, 16), jnp.float32)
    out = jax.block_until_ready(pallas_round(x))
    ref = jnp.round(x)
    assert out.shape == x.shape and out.dtype == x.dtype
    assert jnp.array_equal(out, ref), "round mismatch (small input)"

    # Exercise round-half-to-even ties explicitly.
    halves = jnp.array([0.5, 1.5, 2.5, -0.5, -1.5, -2.5, 3.5], jnp.float32)
    out_h = jax.block_until_ready(pallas_round(halves))
    assert jnp.array_equal(out_h, jnp.round(halves)), "tie-breaking mismatch"

    # Exercise the gridded (tiled) path with a larger input.
    big = 7.0 * jax.random.normal(jax.random.PRNGKey(1), (4, 1024, 1024),
                                  jnp.float32)
    out_b = jax.block_until_ready(pallas_round(big))
    assert jnp.array_equal(out_b, jnp.round(big)), "round mismatch (big input)"

    print("KERNEL_OK")
</pallas_src>

<mosaic_0001>
module attributes {stable_mosaic.version = 11 : i64} {
  func.func @_round_kernel(%arg0: memref<4x512xf32, #tpu.memory_space<vmem>>, %arg1: memref<4x512xf32, #tpu.memory_space<vmem>>) attributes {dimension_semantics = [], scalar_prefetch = 0 : i64, scratch_operands = 0 : i64, tpu.core_type = #tpu.core_type<tc>} {
    %c0 = arith.constant 0 : index
    %c0_0 = arith.constant 0 : index
    %0 = vector.load %arg0[%c0, %c0_0] : memref<4x512xf32, #tpu.memory_space<vmem>>, vector<4x512xf32>
    %1 = math.roundeven %0 : vector<4x512xf32>
    %c0_1 = arith.constant 0 : index
    %c0_2 = arith.constant 0 : index
    %2 = vector.load %arg1[%c0_1, %c0_2] : memref<4x512xf32, #tpu.memory_space<vmem>>, vector<4x512xf32>
    tpu.vector_store %arg1[%c0_1, %c0_2], %1 {strides = array<i32>} : memref<4x512xf32, #tpu.memory_space<vmem>>, vector<4x512xf32>,
    return
  }
}

</mosaic_0001>

<bundles_post_ra>
// kernel: tpu_custom_call.1
= control target key start
LH: loop header
LB: loop body
LE: loop exit
PB: predicated region body
PF: predicated region fallthrough
CT: control target
= control target key end

     0   :  { %6 = vsyncpa [#allocation3], 0  ;;  %s130_s0 = inlined_call_operand.hbm [shape: f32[4,512], index: 0, kind: input, shape index: {}]   ;;  %s131_s1 = inlined_call_operand.hbm [shape: f32[4,512], index: 1, kind: output, shape index: {}]  }
   0x1   :  { %7 = vsyncpa [#allocation4], 0  ;;  %s94_s6 = smov [#allocation2]   ;;  %s46_s10 = scalar_lea.hbm %s130_s0, 256 }
   0x2   :  { %s14_s7 = sshll.u32 %s94_s6, 4  ;;  %p47_p0 = scmp.ne.s32.totalorder %s130_s0, %s46_s10  ;;  %s15_s7 = int_to_ptr.vmem [resolvable:$true] %s14_s7 }
   0x3   :  { %p50_p1 = scmp.lt.u32.totalorder %s46_s10, %s130_s0 }
   0x5   :  { %p52_p2 = pnand %p50_p1, %p47_p0 }
   0x7   :  { %55 = shalt.err (!%p52_p2)
}
   0x8   :  { %s56_s15 = scalar_lea.vmem %s15_s7, 256  ;;  %p61_p4 = scmp.lt.s32.totalorder %s15_s7, %s15_s7 }
   0x9   :  { %p57_p3 = scmp.ne.s32.totalorder %s15_s7, %s56_s15  ;;  %p62_p5 = scmp.lt.s32.totalorder %s56_s15, %s56_s15 }
   0xb   :  { %p63_p6 = por %p62_p5, %p61_p4 }
   0xd   :  { %p64_p7 = pnand %p63_p6, %p57_p3 }
   0xf   :  { %67 = shalt.err (!%p64_p7)
}
  0x10   :  { %17 = dma.hbm_to_vmem [thread:$0]  %s130_s0, 256, %s15_s7, [#allocation3]  }
  0x11   :  { %90 = dma.done.wait [#allocation3], 256  }
  0x12   :  { %91 = vsyncadd [#allocation3], 4294967040  ;;  %s95_s18 = smov [#allocation5]   ;;  %v21_v0 = vld [vmem:[#allocation2] sm:$0xff]  ;;  %v22_v1 = vld [vmem:[#allocation2 + $0x8] sm:$0xff] }
  0x13   :  { %s33_s19 = sshll.u32 %s95_s18, 4  ;;  %v42_v2 = vround.rtne.f32 %v21_v0  ;;  %v43_v3 = vround.rtne.f32 %v22_v1  ;;  %s34_s19 = int_to_ptr.vmem [resolvable:$true] %s33_s19 }
  0x14   :  { %s68_s20 = scalar_lea.vmem %s34_s19, 256  ;;  %p73_p9 = scmp.lt.s32.totalorder %s34_s19, %s34_s19 }
  0x15   :  { %25 = vst [vmem:[#allocation5] sm:$0xff] %v42_v2  ;;  %26 = vst [vmem:[#allocation5 + $0x8] sm:$0xff] %v43_v3  ;;  %p69_p8 = scmp.ne.s32.totalorder %s34_s19, %s68_s20  ;;  %p74_p10 = scmp.lt.s32.totalorder %s68_s20, %s68_s20 }
  0x17   :  { %p75_p11 = por %p74_p10, %p73_p9 }
  0x19   :  { %p76_p12 = pnand %p75_p11, %p69_p8 }
  0x1b   :  { %79 = shalt.err (!%p76_p12)
}
  0x1c   :  { %s80_s22 = scalar_lea.hbm %s131_s1, 256 }
  0x1d   :  { %p81_p13 = scmp.ne.s32.totalorder %s131_s1, %s80_s22  ;;  %p84_p0 = scmp.lt.u32.totalorder %s80_s22, %s131_s1 }
  0x1f   :  { %p86_p1 = pnand %p84_p0, %p81_p13 }
  0x21   :  { %89 = shalt.err (!%p86_p1)
}
  0x22   :  { %36 = dma.vmem_to_hbm [thread:$0]  %s34_s19, 256, %s131_s1, [#allocation4]  }
  0x23   :  { %92 = dma.done.wait [#allocation4], 256  }
  0x24   :  { %93 = vsyncadd [#allocation4], 4294967040 }
  0x25   :  { %40 = vsyncpa [#allocation3], 1 }
  0x26   :  { %41 = vsyncpa [#allocation4], 1 }

</bundles_post_ra>
